<compile_context>
chip_gen: v7x
topology: tpu7x:2x2x1
jax: 0.10.0
libtpu: 0.0.40
codegen_flags: <defaults>
</compile_context>

<pallas_src>
import jax
import jax.numpy as jnp
from jax.experimental import pallas as pl
from jax.experimental.pallas import tpu as pltpu


def _round_up(x, m):
    return ((x + m - 1) // m) * m


def _discriminator_kernel(z_ref, w1_ref, w2_ref, w3_ref, w4_ref, b_ref, out_ref):
    """One batch tile: z_ref (D, TB) -> out_ref (1, TB); all operands in VMEM."""
    x = z_ref[...]                     # (D, TB)  batch on lanes (lane-dense)
    w1 = w1_ref[...]                   # (H, D)
    b = b_ref[...]                     # (H, 4)   packed biases
    b1 = b[:, 0:1]                     # (H, 1)
    b2 = b[:, 1:2]
    b3 = b[:, 2:3]
    b4 = b[0:1, 3:4]                   # (1, 1)

    # Layer 1 (K = D = 4) on the VPU: D broadcast multiply-adds over the
    # (H, TB) tile.  A K=4 MXU matmul would pad K to 128 (~3% utilization).
    D = w1.shape[1]
    acc = w1[:, 0:1] * x[0:1, :]
    for d in range(1, D):
        acc = acc + w1[:, d:d + 1] * x[d:d + 1, :]
    h = jnp.maximum(acc + b1, 0.0)                                   # (H, TB)

    # Layers 2/3 (+ ReLU): MXU matmuls with lane-dense (H, TB) results.
    h = jnp.maximum(
        jnp.dot(w2_ref[...], h, preferred_element_type=jnp.float32) + b2, 0.0)
    h = jnp.maximum(
        jnp.dot(w3_ref[...], h, preferred_element_type=jnp.float32) + b3, 0.0)

    # Layer 4 (N=1) as a VPU multiply + sublane (XLU) reduction; keeps the MXU
    # free and yields a lane-dense (1, TB) row.
    logits = jnp.sum(h * w4_ref[...], axis=0, keepdims=True) + b4    # (1, TB)
    out_ref[...] = jax.nn.sigmoid(logits).astype(out_ref.dtype)


def prepare_params(params):
    """One-time parameter prep (f32 casts, w4 transpose, bias packing).

    Call once at init / param-update time; pass the result to
    discriminator_forward so the per-call wrapper does no parameter work.
    """
    w1 = params["w1"]                          # (H, D)  torch (out, in) layout
    H = w1.shape[0]
    b_packed = jnp.stack(
        [params["b1"], params["b2"], params["b3"],
         jnp.pad(params["b4"], (0, H - 1))],
        axis=1).astype(jnp.float32)            # (H, 4); ln_4 bias at [0, 3]
    return {
        "w1": w1.astype(jnp.float32),                    # (H, D)
        "w2": params["w2"].astype(jnp.float32),          # (H, H)
        "w3": params["w3"].astype(jnp.float32),          # (H, H)
        "w4col": params["w4"].T.astype(jnp.float32),     # (H, 1)
        "b_packed": b_packed,                            # (H, 4)
    }


def discriminator_forward(z, params, *, block_batch=65536):
    """Mirrors torch's z.view(-1, D) followed by the 4-layer MLP; returns (B, 1).

    `params` may be the raw dict from init_params or the output of
    prepare_params (preferred: prepare once, reuse every call).
    """
    p = params if "w4col" in params else prepare_params(params)
    w1, w2, w3, w4col, b_packed = p["w1"], p["w2"], p["w3"], p["w4col"], p["b_packed"]
    H, D = w1.shape

    z2d = z.reshape(-1, D).astype(jnp.float32)
    B = z2d.shape[0]

    # --- Batch-tile selection -------------------------------------------
    # Lane dim must be a multiple of 128; round a user-supplied block_batch up.
    B128 = _round_up(max(B, 1), 128)
    TB = min(_round_up(block_batch, 128), B128)
    # Prefer >= 2 grid steps when the batch allows it so the "parallel" axis
    # can shard across v7x's two TensorCores (costs at most one extra ~0.35us
    # step on single-TensorCore chips).
    if B128 >= 2 * 128:
        TB = min(TB, _round_up((B128 + 1) // 2, 128))
    n_blocks = pl.cdiv(B128, TB)
    B_pad = n_blocks * TB

    # Transpose first, then pad along lanes (zero columns are sliced off).
    # TODO(synk): if the producer can emit z already in (D, B) layout, skip
    # this transpose pass entirely.
    zT = z2d.T                                              # (D, B)
    if B_pad != B:
        zT = jnp.pad(zT, ((0, 0), (0, B_pad - B)))          # (D, B_pad)

    const = lambda shape: pl.BlockSpec(shape, lambda i: (0, 0))  # VMEM-resident

    flops_per_elem = 2 * (D * H + H * H + H * H + H)        # = 1184 for D=4
    weight_bytes = 4 * (H * D + 2 * H * H + H + 4 * H)
    cost = pl.CostEstimate(
        flops=flops_per_elem * B_pad,
        transcendentals=B_pad,                               # sigmoid exp
        bytes_accessed=(D + 1) * 4 * B_pad + weight_bytes)

    out_slab = pl.pallas_call(
        _discriminator_kernel,
        out_shape=jax.ShapeDtypeStruct((1, B_pad), jnp.float32),
        grid=(n_blocks,),
        in_specs=[
            pl.BlockSpec((D, TB), lambda i: (0, i)),    # z tile
            const((H, D)),                              # w1
            const((H, H)),                              # w2
            const((H, H)),                              # w3
            const((H, 1)),                              # w4 column
            const((H, 4)),                              # packed biases
        ],
        out_specs=pl.BlockSpec((1, TB), lambda i: (0, i)),
        compiler_params=pltpu.CompilerParams(
            dimension_semantics=("parallel",),
            vmem_limit_bytes=32 * 1024 * 1024),
        cost_estimate=cost,
    )(zT, w1, w2, w3, w4col, b_packed)

    return out_slab[:, :B].reshape(B, 1)


def init_params(key, latent_dims=4):
    """Deterministic init matching nn.Linear shapes (torch (out, in) layout)."""
    H = latent_dims * 4
    keys = jax.random.split(key, 8)

    def linear(kw, kb, fan_in, fan_out):
        bound = 1.0 / jnp.sqrt(float(fan_in))
        w = jax.random.uniform(kw, (fan_out, fan_in), jnp.float32, -bound, bound)
        b = jax.random.uniform(kb, (fan_out,), jnp.float32, -bound, bound)
        return w, b

    w1, b1 = linear(keys[0], keys[1], latent_dims, H)
    w2, b2 = linear(keys[2], keys[3], H, H)
    w3, b3 = linear(keys[4], keys[5], H, H)
    w4, b4 = linear(keys[6], keys[7], H, 1)
    return {"w1": w1, "b1": b1, "w2": w2, "b2": b2,
            "w3": w3, "b3": b3, "w4": w4, "b4": b4}


def _reference_forward(z, params):
    """Pure-JAX reference for correctness check."""
    D = params["w1"].shape[1]
    x = z.reshape(-1, D).astype(jnp.float32)
    h = jax.nn.relu(x @ params["w1"].T + params["b1"])
    h = jax.nn.relu(h @ params["w2"].T + params["b2"])
    h = jax.nn.relu(h @ params["w3"].T + params["b3"])
    return jax.nn.sigmoid(h @ params["w4"].T + params["b4"])


if __name__ == "__main__":
    latent_dims = 4

    key = jax.random.PRNGKey(0)
    k_param, k_z1, k_z2 = jax.random.split(key, 3)
    params = init_params(k_param, latent_dims=latent_dims)
    prepared = prepare_params(params)          # one-time parameter prep

    # Small case (typical usage): single grid step, default block_batch.
    z = jax.random.normal(k_z1, (8, latent_dims), dtype=jnp.float32)
    out = jax.block_until_ready(discriminator_forward(z, prepared))
    ref = _reference_forward(z, params)
    assert out.shape == (8, 1), out.shape
    assert jnp.allclose(out, ref, atol=1e-5, rtol=1e-5), (out, ref)

    # Larger ragged batch with the default (auto-capped, >=2 blocks) tiling.
    z2 = jax.random.normal(k_z2, (300, latent_dims), dtype=jnp.float32)
    out2 = jax.block_until_ready(discriminator_forward(z2, prepared))
    ref2 = _reference_forward(z2, params)
    assert out2.shape == (300, 1), out2.shape
    assert jnp.allclose(out2, ref2, atol=1e-5, rtol=1e-5)

    # Non-multiple-of-128 block_batch must round up cleanly (multi-step grid).
    out3 = jax.block_until_ready(
        discriminator_forward(z2, prepared, block_batch=200))
    assert out3.shape == (300, 1), out3.shape
    assert jnp.allclose(out3, ref2, atol=1e-5, rtol=1e-5)

    print("KERNEL_OK")
</pallas_src>

<mosaic_0001>
module attributes {stable_mosaic.version = 11 : i64} {
  func.func @_discriminator_kernel(%arg0: i32, %arg1: memref<4x128xf32, #tpu.memory_space<vmem>>, %arg2: memref<16x4xf32, #tpu.memory_space<vmem>>, %arg3: memref<16x16xf32, #tpu.memory_space<vmem>>, %arg4: memref<16x16xf32, #tpu.memory_space<vmem>>, %arg5: memref<16x1xf32, #tpu.memory_space<vmem>>, %arg6: memref<16x4xf32, #tpu.memory_space<vmem>>, %arg7: memref<1x128xf32, #tpu.memory_space<vmem>>) attributes {dimension_semantics = [#tpu.dimension_semantics<parallel>], iteration_bounds = array<i64: 1>, scalar_prefetch = 0 : i64, scratch_operands = 0 : i64, tpu.core_type = #tpu.core_type<tc>, window_params = [{transform_indices = @transform_0, window_bounds = array<i64: 4, 128>}, {pipeline_mode = #tpu.pipeline_mode<synchronous>, transform_indices = @transform_1, window_bounds = array<i64: 16, 4>}, {pipeline_mode = #tpu.pipeline_mode<synchronous>, transform_indices = @transform_2, window_bounds = array<i64: 16, 16>}, {pipeline_mode = #tpu.pipeline_mode<synchronous>, transform_indices = @transform_3, window_bounds = array<i64: 16, 16>}, {pipeline_mode = #tpu.pipeline_mode<synchronous>, transform_indices = @transform_4, window_bounds = array<i64: 16, 1>}, {pipeline_mode = #tpu.pipeline_mode<synchronous>, transform_indices = @transform_5, window_bounds = array<i64: 16, 4>}, {transform_indices = @transform_6, window_bounds = array<i64: 1, 128>}]} {
    %c0 = arith.constant 0 : index
    %c0_0 = arith.constant 0 : index
    %0 = vector.load %arg1[%c0, %c0_0] : memref<4x128xf32, #tpu.memory_space<vmem>>, vector<4x128xf32>
    %c0_1 = arith.constant 0 : index
    %c0_2 = arith.constant 0 : index
    %1 = vector.load %arg2[%c0_1, %c0_2] : memref<16x4xf32, #tpu.memory_space<vmem>>, vector<16x4xf32>
    %c0_3 = arith.constant 0 : index
    %c0_4 = arith.constant 0 : index
    %2 = vector.load %arg6[%c0_3, %c0_4] : memref<16x4xf32, #tpu.memory_space<vmem>>, vector<16x4xf32>
    %3 = vector.extract_strided_slice %2 {offsets = [0, 0], sizes = [16, 1], strides = [1, 1]} : vector<16x4xf32> to vector<16x1xf32>
    %4 = vector.extract_strided_slice %2 {offsets = [0, 1], sizes = [16, 1], strides = [1, 1]} : vector<16x4xf32> to vector<16x1xf32>
    %5 = vector.extract_strided_slice %2 {offsets = [0, 2], sizes = [16, 1], strides = [1, 1]} : vector<16x4xf32> to vector<16x1xf32>
    %6 = vector.extract_strided_slice %2 {offsets = [0, 3], sizes = [1, 1], strides = [1, 1]} : vector<16x4xf32> to vector<1x1xf32>
    %7 = vector.extract_strided_slice %1 {offsets = [0, 0], sizes = [16, 1], strides = [1, 1]} : vector<16x4xf32> to vector<16x1xf32>
    %8 = vector.extract_strided_slice %0 {offsets = [0, 0], sizes = [1, 128], strides = [1, 1]} : vector<4x128xf32> to vector<1x128xf32>
    %9 = vector.broadcast %7 : vector<16x1xf32> to vector<16x128xf32>
    %10 = vector.broadcast %8 : vector<1x128xf32> to vector<16x128xf32>
    %11 = arith.mulf %9, %10 : vector<16x128xf32>
    %12 = vector.extract_strided_slice %1 {offsets = [0, 1], sizes = [16, 1], strides = [1, 1]} : vector<16x4xf32> to vector<16x1xf32>
    %13 = vector.extract_strided_slice %0 {offsets = [1, 0], sizes = [1, 128], strides = [1, 1]} : vector<4x128xf32> to vector<1x128xf32>
    %14 = vector.broadcast %12 : vector<16x1xf32> to vector<16x128xf32>
    %15 = vector.broadcast %13 : vector<1x128xf32> to vector<16x128xf32>
    %16 = arith.mulf %14, %15 : vector<16x128xf32>
    %17 = arith.addf %11, %16 : vector<16x128xf32>
    %18 = vector.extract_strided_slice %1 {offsets = [0, 2], sizes = [16, 1], strides = [1, 1]} : vector<16x4xf32> to vector<16x1xf32>
    %19 = vector.extract_strided_slice %0 {offsets = [2, 0], sizes = [1, 128], strides = [1, 1]} : vector<4x128xf32> to vector<1x128xf32>
    %20 = vector.broadcast %18 : vector<16x1xf32> to vector<16x128xf32>
    %21 = vector.broadcast %19 : vector<1x128xf32> to vector<16x128xf32>
    %22 = arith.mulf %20, %21 : vector<16x128xf32>
    %23 = arith.addf %17, %22 : vector<16x128xf32>
    %24 = vector.extract_strided_slice %1 {offsets = [0, 3], sizes = [16, 1], strides = [1, 1]} : vector<16x4xf32> to vector<16x1xf32>
    %25 = vector.extract_strided_slice %0 {offsets = [3, 0], sizes = [1, 128], strides = [1, 1]} : vector<4x128xf32> to vector<1x128xf32>
    %26 = vector.broadcast %24 : vector<16x1xf32> to vector<16x128xf32>
    %27 = vector.broadcast %25 : vector<1x128xf32> to vector<16x128xf32>
    %28 = arith.mulf %26, %27 : vector<16x128xf32>
    %29 = arith.addf %23, %28 : vector<16x128xf32>
    %30 = vector.broadcast %3 : vector<16x1xf32> to vector<16x128xf32>
    %31 = arith.addf %29, %30 : vector<16x128xf32>
    %cst = arith.constant 0.000000e+00 : f32
    %32 = vector.broadcast %cst : f32 to vector<16x128xf32>
    %33 = arith.maximumf %31, %32 : vector<16x128xf32>
    %c0_5 = arith.constant 0 : index
    %c0_6 = arith.constant 0 : index
    %34 = vector.load %arg3[%c0_5, %c0_6] : memref<16x16xf32, #tpu.memory_space<vmem>>, vector<16x16xf32>
    %cst_7 = arith.constant dense<0.000000e+00> : vector<16x128xf32>
    %35 = tpu.matmul %34, %33, %cst_7 {dimension_numbers = #tpu.dot_dimension_numbers<[1], [0], [0], [1], [0, 0, 1, 1], [], []>} : vector<16x16xf32>, vector<16x128xf32>, vector<16x128xf32> -> vector<16x128xf32>
    %36 = vector.broadcast %4 : vector<16x1xf32> to vector<16x128xf32>
    %37 = arith.addf %35, %36 : vector<16x128xf32>
    %cst_8 = arith.constant 0.000000e+00 : f32
    %38 = vector.broadcast %cst_8 : f32 to vector<16x128xf32>
    %39 = arith.maximumf %37, %38 : vector<16x128xf32>
    %c0_9 = arith.constant 0 : index
    %c0_10 = arith.constant 0 : index
    %40 = vector.load %arg4[%c0_9, %c0_10] : memref<16x16xf32, #tpu.memory_space<vmem>>, vector<16x16xf32>
    %cst_11 = arith.constant dense<0.000000e+00> : vector<16x128xf32>
    %41 = tpu.matmul %40, %39, %cst_11 {dimension_numbers = #tpu.dot_dimension_numbers<[1], [0], [0], [1], [0, 0, 1, 1], [], []>} : vector<16x16xf32>, vector<16x128xf32>, vector<16x128xf32> -> vector<16x128xf32>
    %42 = vector.broadcast %5 : vector<16x1xf32> to vector<16x128xf32>
    %43 = arith.addf %41, %42 : vector<16x128xf32>
    %cst_12 = arith.constant 0.000000e+00 : f32
    %44 = vector.broadcast %cst_12 : f32 to vector<16x128xf32>
    %45 = arith.maximumf %43, %44 : vector<16x128xf32>
    %c0_13 = arith.constant 0 : index
    %c0_14 = arith.constant 0 : index
    %46 = vector.load %arg5[%c0_13, %c0_14] : memref<16x1xf32, #tpu.memory_space<vmem>>, vector<16x1xf32>
    %47 = vector.broadcast %46 : vector<16x1xf32> to vector<16x128xf32>
    %48 = arith.mulf %45, %47 : vector<16x128xf32>
    %cst_15 = arith.constant dense<0.000000e+00> : vector<128xf32>
    %49 = vector.multi_reduction <add>, %48, %cst_15 [0] : vector<16x128xf32> to vector<128xf32>
    %50 = vector.shape_cast %49 : vector<128xf32> to vector<1x128xf32>
    %51 = vector.broadcast %6 : vector<1x1xf32> to vector<1x128xf32>
    %52 = arith.addf %50, %51 : vector<1x128xf32>
    %53 = arith.negf %52 : vector<1x128xf32>
    %54 = math.exp %53 : vector<1x128xf32>
    %cst_16 = arith.constant 1.000000e+00 : f32
    %55 = vector.broadcast %cst_16 : f32 to vector<1x128xf32>
    %56 = arith.addf %55, %54 : vector<1x128xf32>
    %57 = arith.divf %55, %56 : vector<1x128xf32>
    %c0_17 = arith.constant 0 : index
    %c0_18 = arith.constant 0 : index
    %58 = vector.load %arg7[%c0_17, %c0_18] : memref<1x128xf32, #tpu.memory_space<vmem>>, vector<1x128xf32>
    tpu.vector_store %arg7[%c0_17, %c0_18], %57 {strides = array<i32>} : memref<1x128xf32, #tpu.memory_space<vmem>>, vector<1x128xf32>,
    return
  }
  func.func @transform_0(%arg0: i32) -> (i32, i32) {
    %c0_i32 = arith.constant 0 : i32
    %c0_i32_0 = arith.constant 0 : i32
    return %c0_i32, %arg0 : i32, i32
  }
  func.func @transform_1(%arg0: i32) -> (i32, i32) {
    %c0_i32 = arith.constant 0 : i32
    %c0_i32_0 = arith.constant 0 : i32
    %c0_i32_1 = arith.constant 0 : i32
    return %c0_i32, %c0_i32_0 : i32, i32
  }
  func.func @transform_2(%arg0: i32) -> (i32, i32) {
    %c0_i32 = arith.constant 0 : i32
    %c0_i32_0 = arith.constant 0 : i32
    %c0_i32_1 = arith.constant 0 : i32
    return %c0_i32, %c0_i32_0 : i32, i32
  }
  func.func @transform_3(%arg0: i32) -> (i32, i32) {
    %c0_i32 = arith.constant 0 : i32
    %c0_i32_0 = arith.constant 0 : i32
    %c0_i32_1 = arith.constant 0 : i32
    return %c0_i32, %c0_i32_0 : i32, i32
  }
  func.func @transform_4(%arg0: i32) -> (i32, i32) {
    %c0_i32 = arith.constant 0 : i32
    %c0_i32_0 = arith.constant 0 : i32
    %c0_i32_1 = arith.constant 0 : i32
    return %c0_i32, %c0_i32_0 : i32, i32
  }
  func.func @transform_5(%arg0: i32) -> (i32, i32) {
    %c0_i32 = arith.constant 0 : i32
    %c0_i32_0 = arith.constant 0 : i32
    %c0_i32_1 = arith.constant 0 : i32
    return %c0_i32, %c0_i32_0 : i32, i32
  }
  func.func @transform_6(%arg0: i32) -> (i32, i32) {
    %c0_i32 = arith.constant 0 : i32
    %c0_i32_0 = arith.constant 0 : i32
    return %c0_i32, %arg0 : i32, i32
  }
}

</mosaic_0001>

<bundles_post_ra>
// kernel: tpu_custom_call.1
= control target key start
LH: loop header
LB: loop body
LE: loop exit
PB: predicated region body
PF: predicated region fallthrough
CT: control target
= control target key end

     0   :  { %v422_v1 = vmov 1   ;;  %v423_v2 = vmov 0   ;;  %s511_s0 = inlined_call_operand.vmem [shape: f32[4,128], index: 0, kind: input, shape index: {}]   ;;  %s512_s1 = inlined_call_operand.vmem [shape: f32[16,4], index: 1, kind: input, shape index: {}]   ;;  %s513_s2 = inlined_call_operand.vmem [shape: f32[16,16], index: 2, kind: input, shape index: {}]   ;;  %s514_s3 = inlined_call_operand.vmem [shape: f32[16,16], index: 3, kind: input, shape index: {}]   ;;  %s515_s4 = inlined_call_operand.vmem [shape: f32[16,1], index: 4, kind: input, shape index: {}]   ;;  %s516_s5 = inlined_call_operand.vmem [shape: f32[16,4], index: 5, kind: input, shape index: {}]   ;;  %s517_s6 = inlined_call_operand.hbm [shape: f32[1,128], index: 6, kind: output, shape index: {}]  }
   0x1   :  { %v25_v0 = vld [vmem:[%s512_s1] sm:$0xff]  ;;  %382 = vset.pattern.permute.xlu1 %v422_v1  ;;  %381 = vset.pattern.permute.xlu0 %v423_v2 }
   0x2   :  { %46 = vperm.xlu1 %382, %v25_v0   ;;  %31 = vperm.xlu0 %381, %v25_v0  }
   0x3   :  { %11 = vsyncpa [#allocation3], 0  ;;  %v26_v3 = vld [vmem:[%s512_s1 + $0x8] sm:$0xff]  ;;  %v424_v4 = vmov 2   ;;  %v425_v5 = vmov 3   ;;  %v27_v6 = vld [vmem:[%s516_s5] sm:$0xff]  ;;  %v39_v9 = vlaneseq }
   0x4   :  { %v28_v7 = vld [vmem:[%s516_s5 + $0x8] sm:$0xff]  ;;  %v107_v8 = vld [vmem:[%s513_s2] sm:$0xff]  ;;  %vm117_vm0 = vcmask 130048  }
   0x5   :  { %358 = vmatprep.mubr.msk.f32.mxu0 %vm117_vm0, %v107_v8  ;;  %v40_v10 = vshrl.u32 %v39_v9, 7  ;;  %v24_v15 = vld [vmem:[%s511_s0] sm:$0xf]  ;;  %v108_v49 = vld [vmem:[%s513_s2 + $0x8] sm:$0xff] }
   0x6   :  { %50 = vperm.xlu1 %382, %v26_v3   ;;  %36 = vperm.xlu0 %381, %v26_v3   ;;  %v201_v50 = vld [vmem:[%s514_s3] sm:$0xff]  ;;  %v295_v52 = vld [vmem:[%s515_s4 + $0x8] sm:$0xff] }
   0x7   :  { %v55_v13 = vsub.s32 1, %v40_v10  ;;  %v41_v14 = vsub.s32 0, %v40_v10  ;;  %v71_v18 = vsub.s32 2, %v40_v10  ;;  %v87_v21 = vsub.s32 3, %v40_v10  ;;  %365 = vmatprep.mubr.msk.f32.mxu1 %vm117_vm0, %v201_v50  ;;  %v294_v51 = vld [vmem:[%s515_s4] sm:$0xff]  ;;  %v202_v62 = vld [vmem:[%s514_s3 + $0x8] sm:$0xff] }
   0x8   :  { %s426_s3 = smov [#allocation2]  }
   0x9   :  { %v56_v19 = vrot.slane %v24_v15, %v55_v13  ;;  %v42_v20 = vrot.slane %v24_v15, %v41_v14  ;;  %v72_v22 = vrot.slane %v24_v15, %v71_v18  ;;  %v88_v27 = vrot.slane %v24_v15, %v87_v21  ;;  %s333_s4 = sshll.u32 %s426_s3, 4  ;;  %s334_s4 = int_to_ptr.vmem [resolvable:$true] %s333_s4 }
   0xa   :  { %384 = vset.pattern.permute.xlu1 %v424_v4  ;;  %383 = vset.pattern.permute.xlu0 %v424_v4  ;;  %s398_s15 = scalar_lea.vmem %s334_s4, 16  ;;  %s402_s16 = scalar_lea.vmem %s334_s4, 32 }
   0xb   :  { %66 = vperm.xlu1 %384, %v26_v3   ;;  %62 = vperm.xlu0 %383, %v25_v0   ;;  %p399_p0 = scmp.ne.s32.totalorder %s334_s4, %s398_s15  ;;  %p403_p1 = scmp.lt.s32.totalorder %s334_s4, %s334_s4 }
   0xc   :  { %p404_p2 = scmp.lt.s32.totalorder %s402_s16, %s398_s15 }
   0xe   :  { %p405_p3 = por %p404_p2, %p403_p1 }
   0xf   :  { %385 = vset.pattern.permute.xlu1 %v425_v5  ;;  %386 = vset.pattern.permute.xlu0 %v425_v5 }
  0x10   :  { %78 = vperm.xlu1 %385, %v25_v0   ;;  %82 = vperm.xlu0 %386, %v26_v3   ;;  %p406_p4 = pnand %p405_p3, %p399_p0 }
  0x14   :  { %387 = vset.pattern.permute.xlu1 %v423_v2  ;;  %388 = vset.pattern.permute.xlu0 %v422_v1 }
  0x15   :  { %95 = vperm.xlu1 %387, %v27_v6   ;;  %110 = vperm.xlu0 %388, %v27_v6  }
  0x19   :  { %100 = vperm.xlu1 %387, %v28_v7   ;;  %391 = vset.pattern.permute.xlu0 %v424_v4 }
  0x1a   :  { %208 = vperm.xlu0 %391, %v28_v7  }
  0x1d   :  { %389 = vset.pattern.permute.xlu1 %v422_v1 }
  0x1e   :  { %114 = vperm.xlu1 %389, %v28_v7   ;;  %393 = vset.pattern.permute.xlu0 %v425_v5 }
  0x1f   :  { %316 = vperm.xlu0 %393, %v27_v6  }
  0x22   :  { %390 = vset.pattern.permute.xlu1 %v424_v4 }
  0x23   :  { %204 = vperm.xlu1 %390, %v27_v6  }
  0x27   :  { %392 = vset.pattern.permute.xlu1 %v423_v2 }
  0x28   :  { %298 = vperm.xlu1 %392, %v294_v51  }
  0x2c   :  { %303 = vperm.xlu1 %392, %v295_v52  }
  0x81   :  { %v47_v11 = vpop.permute.xlu1 %46  ;;  %v32_v12 = vpop.permute.xlu0 %31 }
  0x82   :  { %v57_v25 = vmul.f32 %v56_v19, %v47_v11  ;;  %v43_v26 = vmul.f32 %v42_v20, %v32_v12 }
  0x84   :  { %v59_v29 = vadd.f32 %v57_v25, %v43_v26 }
  0x85   :  { %v51_v16 = vpop.permute.xlu1 %50  ;;  %v37_v17 = vpop.permute.xlu0 %36 }
  0x86   :  { %v58_v30 = vmul.f32 %v56_v19, %v51_v16  ;;  %v44_v31 = vmul.f32 %v42_v20, %v37_v17 }
  0x88   :  { %v60_v37 = vadd.f32 %v58_v30, %v44_v31 }
  0x8a   :  { %v67_v23 = vpop.permute.xlu1 %66  ;;  %v63_v24 = vpop.permute.xlu0 %62 }
  0x8b   :  { %v73_v28 = vmul.f32 %v72_v22, %v63_v24  ;;  %v74_v35 = vmul.f32 %v72_v22, %v67_v23 }
  0x8d   :  { %v75_v36 = vadd.f32 %v73_v28, %v59_v29  ;;  %v76_v41 = vadd.f32 %v74_v35, %v60_v37 }
  0x8f   :  { %v79_v32 = vpop.permute.xlu1 %78  ;;  %v83_v34 = vpop.permute.xlu0 %82 }
  0x90   :  { %v89_v33 = vmul.f32 %v88_v27, %v79_v32  ;;  %v90_v38 = vmul.f32 %v88_v27, %v83_v34 }
  0x92   :  { %v91_v39 = vadd.f32 %v89_v33, %v75_v36  ;;  %v92_v43 = vadd.f32 %v90_v38, %v76_v41 }
  0x94   :  { %v96_v40 = vpop.permute.xlu1 %95  ;;  %v111_v54 = vpop.permute.xlu0 %110 }
  0x95   :  { %v103_v42 = vadd.f32 %v96_v40, %v91_v39 }
  0x97   :  { %v105_v46 = vmax.f32 %v103_v42, 0.0 }
  0x98   :  { %v101_v44 = vpop.permute.xlu1 %100 }
  0x99   :  { %v104_v45 = vadd.f32 %v101_v44, %v92_v43  ;;  %v209_v1 = vpop.permute.xlu0 %208 }
  0x9b   :  { %v106_v47 = vmax.f32 %v104_v45, 0.0 }
  0x9d   :  { %v368_v48 = vpack.c.bf16 %v106_v47, %v105_v46  ;;  %v115_v53 = vpop.permute.xlu1 %114 }
  0x9e   :  { %v317_v17 = vpop.permute.xlu0 %316 }
  0x9f   :  { %369 = vmatprep.subr.bf16.mxu0 %v368_v48 }
  0xa0   :  { %371 = vmatpush3.bf16.msra.mxu0 %v368_v48 }
  0xa2   :  { %v205_v63 = vpop.permute.xlu1 %204 }
  0xa3   :  { %359 = vmatmul.mubr.msk.f32.vlgmr.msra.gmra.mrb[0].mxu0 %vm117_vm0, %v108_v49 }
  0xa7   :  { %v299_v0 = vpop.permute.xlu1 %298 }
  0xab   :  { %v304_v7 = vpop.permute.xlu1 %303 }
 0x176   :  { %v360_v55 = vpop.f32.mrb[0].mxu0 }
 0x177   :  { %v196_v56 = vadd.f32 %v360_v55, %v115_v53  ;;  %v190_v57 = vpop.f32.mrb[1].mxu0 }
 0x178   :  { %v191_v58 = vadd.f32 %v190_v57, %v111_v54 }
 0x179   :  { %v200_v59 = vmax.f32 %v196_v56, 0.0 }
 0x17a   :  { %v199_v60 = vmax.f32 %v191_v58, 0.0 }
 0x17c   :  { %v372_v61 = vpack.c.bf16 %v200_v59, %v199_v60 }
 0x17e   :  { %373 = vmatprep.subr.bf16.mxu1 %v372_v61 }
 0x17f   :  { %375 = vmatpush3.bf16.msra.mxu1 %v372_v61 }
 0x182   :  { %366 = vmatmul.mubr.msk.f32.vlgmr.msra.gmra.mrb[0].mxu1 %vm117_vm0, %v202_v62 }
 0x255   :  { %v367_v2 = vpop.f32.mrb[0].mxu1 }
 0x256   :  { %v289_v3 = vadd.f32 %v367_v2, %v209_v1  ;;  %v283_v4 = vpop.f32.mrb[1].mxu1 }
 0x257   :  { %v284_v5 = vadd.f32 %v283_v4, %v205_v63 }
 0x258   :  { %v293_v6 = vmax.f32 %v289_v3, 0.0 }
 0x259   :  { %v292_v8 = vmax.f32 %v284_v5, 0.0 }
 0x25a   :  { %v307_v9 = vmul.f32 %v304_v7, %v293_v6 }
 0x25b   :  { %v306_v10 = vmul.f32 %v299_v0, %v292_v8 }
 0x25d   :  { %v308_v11 = vadd.f32 %v307_v9, %v306_v10 }
 0x25f   :  { %v309_v12 = vrot.slane %v308_v11, 4 }
 0x261   :  { %v310_v13 = vadd.f32 %v309_v12, %v308_v11 }
 0x263   :  { %v311_v14 = vrot.slane %v310_v13, 2 }
 0x265   :  { %v312_v15 = vadd.f32 %v311_v14, %v310_v13 }
 0x267   :  { %v313_v16 = vrot.slane %v312_v15, 1 }
 0x269   :  { %v314_v18 = vadd.f32 %v313_v16, %v312_v15 }
 0x26b   :  { %v319_v19 = vadd.f32 %v317_v17, %v314_v18 }
 0x26d   :  { %v345_v20 = vmul.f32 -1.442695, %v319_v19 }
 0x26f   :  { %394 = vpow2.f32 %v345_v20 }
 0x279   :  { %v395_v21 = vpop.eup %394 }
 0x27a   :  { %v323_v22 = vadd.f32 1.0, %v395_v21 }
 0x27c   :  { %396 = vrcp.f32 %v323_v22 }
 0x286   :  { %v397_v23 = vpop.eup %396 }
 0x287   :  { %326 = vst [vmem:[#allocation2] sm:$0x1] %v397_v23 }
 0x288   :  { %409 = shalt.err (!%p406_p4)
}
 0x289   :  { %s410_s19 = scalar_lea.hbm %s517_s6, 16 }
 0x28a   :  { %p411_p5 = scmp.ne.s32.totalorder %s517_s6, %s410_s19  ;;  %p414_p6 = scmp.lt.u32.totalorder %s410_s19, %s517_s6 }
 0x28c   :  { %p416_p7 = pnand %p414_p6, %p411_p5 }
 0x28e   :  { %419 = shalt.err (!%p416_p7)
}
 0x28f   :  { %336 = dma.vmem_to_hbm [thread:$0]  %s334_s4, 16, %s517_s6, [#allocation3]  }
 0x290   :  { %420 = dma.done.wait [#allocation3], 16  }
 0x291   :  { %421 = vsyncadd [#allocation3], 4294967280 }
 0x292   :  { %340 = vsyncpa [#allocation3], 1 }

</bundles_post_ra>
